<compile_context>
chip_gen: v7x
topology: tpu7x:2x2x1
jax: 0.10.0
libtpu: 0.0.40
codegen_flags: <defaults>
</compile_context>

<pallas_src>
import functools

import numpy as np
import jax
import jax.numpy as jnp
from jax.experimental import pallas as pl
from jax.experimental.pallas import tpu as pltpu


def _round_up(x, m):
    return (x + m - 1) // m * m


def _sage_kernel(self_ref, mask_ref, embs_ref, w_ref, bits_ref, out_ref,
                 agg_acc, cnt_acc, *, drop_threshold: int, drop_scale: float):
    k = pl.program_id(1)

    @pl.when(k == 0)
    def _init():
        agg_acc[...] = jnp.zeros_like(agg_acc)
        cnt_acc[...] = jnp.zeros_like(cnt_acc)

    # --- message(): stream one (TN, TU) mask tile x (TU, in_dim) emb tile ------
    mask = mask_ref[...]
    agg_acc[...] += jnp.dot(mask, embs_ref[...],
                            preferred_element_type=jnp.float32)
    cnt_acc[...] += jnp.sum(mask, axis=1, keepdims=True, dtype=jnp.float32)

    # --- epilogue only on the last U-reduction step -----------------------------
    @pl.when(k == pl.num_programs(1) - 1)
    def _finalize():
        # mean aggregation: normalize AFTER the matmul (guard empty rows)
        inv = 1.0 / jnp.maximum(cnt_acc[...], 1.0)                # (TN, 1)
        agg = (agg_acc[...] * inv).astype(w_ref.dtype)            # (TN, in_dim)

        # update(): relu(W @ cat([self, agg]).T).T == relu([self|agg] @ W.T)
        combined = jnp.concatenate(
            [self_ref[...].astype(w_ref.dtype), agg], axis=1)     # (TN, 2*in_dim)
        h = jnp.dot(combined, w_ref[...],
                    preferred_element_type=jnp.float32)           # (TN, out_dim)
        h = jnp.maximum(h, 0.0)

        # F.dropout (inverted, training=True default): integer-threshold compare
        if drop_threshold > 0:
            keep = bits_ref[...] >= np.uint32(drop_threshold)
            h = jnp.where(keep, h * jnp.float32(drop_scale), 0.0)

        out_ref[...] = h.astype(out_ref.dtype)


def sage_layer_forward(nodes_idx, pre_hidden_embs, mask, weight,
                       drop_rate: float = 0.4, rng_key=None,
                       mxu_dtype=jnp.float32, tile_n=None, tile_u=None):
    """Pallas implementation of SageLayer.forward.

    nodes_idx       : (N,) int32   node ids already mapped through unique_nodes
    pre_hidden_embs : (U, in_dim)  float32
    mask            : (N, U)       float32 binary (samp_neighs membership)
    weight          : (out_dim, 2*in_dim) float32 (PyTorch layout)
    mxu_dtype       : dtype for the MXU operands (bf16 halves the dominant
                      mask/embs HBM traffic; accumulation stays f32)
    """
    U, in_dim = pre_hidden_embs.shape
    out_dim = weight.shape[0]
    N = mask.shape[0]
    assert weight.shape[1] == 2 * in_dim

    # ---- glue (mirrors the module's python-side list handling) ----------------
    # TODO(synk): move this gather in-kernel via PrefetchScalarGridSpec +
    # pl.Element row blocks to avoid the extra (N, in_dim) HBM round trip.
    self_feats = pre_hidden_embs[nodes_idx]                 # (N, in_dim)
    w_t = weight.T                                          # (2*in_dim, out_dim)

    mxu_dtype = jnp.dtype(mxu_dtype)
    self_feats = self_feats.astype(mxu_dtype)
    mask_c = mask.astype(mxu_dtype)
    embs_c = pre_hidden_embs.astype(mxu_dtype)
    w_t = w_t.astype(mxu_dtype)

    # ---- tile selection + zero padding (padding adds zero contributions) ------
    if tile_n is None:
        tile_n = 256 if N > 256 else _round_up(N, 8)
    tile_n = _round_up(min(tile_n, _round_up(N, 8)), 8)
    n_pad = _round_up(N, tile_n)

    if tile_u is None:
        tile_u = U if U <= 512 else 512
    if tile_u >= U:
        tile_u, u_pad = U, U
    else:
        tile_u = _round_up(tile_u, 128)
        u_pad = _round_up(U, tile_u)

    if n_pad != N:
        self_feats = jnp.pad(self_feats, ((0, n_pad - N), (0, 0)))
        mask_c = jnp.pad(mask_c, ((0, n_pad - N), (0, 0)))
    if u_pad != U:
        mask_c = jnp.pad(mask_c, ((0, 0), (0, u_pad - U)))
        embs_c = jnp.pad(embs_c, ((0, u_pad - U), (0, 0)))

    # ---- dropout constants + portable random bits ------------------------------
    drop_rate = float(drop_rate)
    if drop_rate > 0.0:
        drop_threshold = min(int(round(drop_rate * (1 << 32))), (1 << 32) - 1)
        drop_scale = 1.0 / (1.0 - drop_rate)
        if rng_key is None:
            rng_key = jax.random.PRNGKey(0)
        # TODO(synk): on hardware this could use pltpu.prng_seed with a per-tile
        # seed to avoid the (N, out_dim) uint32 HBM read; generated host-side so
        # the kernel also runs under TPU interpret mode.
        bits = jax.random.bits(rng_key, (n_pad, out_dim), dtype=jnp.uint32)
    else:
        drop_threshold, drop_scale = 0, 1.0
        bits = jnp.zeros((n_pad, out_dim), dtype=jnp.uint32)

    grid = (n_pad // tile_n, u_pad // tile_u)

    # rough VMEM budget -> explicit scoped limit (matters on v7x's 64 MiB VMEM)
    elt = mxu_dtype.itemsize
    est = (2 * (tile_n * tile_u + tile_u * in_dim + tile_n * in_dim) * elt   # streams
           + 2 * tile_n * out_dim * (4 + 4)                                  # bits + out
           + 2 * 2 * in_dim * out_dim * elt                                  # resident W^T
           + tile_n * (in_dim + 1) * 4)                                      # f32 accumulators
    vmem_limit = int(min(max(2 * est, 32 * 1024 * 1024), 48 * 1024 * 1024))

    kernel = functools.partial(_sage_kernel,
                               drop_threshold=drop_threshold,
                               drop_scale=drop_scale)

    out = pl.pallas_call(
        kernel,
        out_shape=jax.ShapeDtypeStruct((n_pad, out_dim), jnp.float32),
        grid_spec=pltpu.PrefetchScalarGridSpec(
            num_scalar_prefetch=0,
            grid=grid,
            in_specs=[
                pl.BlockSpec((tile_n, in_dim), lambda i, k: (i, 0)),       # self feats
                pl.BlockSpec((tile_n, tile_u), lambda i, k: (i, k)),       # mask tiles
                pl.BlockSpec((tile_u, in_dim), lambda i, k: (k, 0)),       # embedding tiles
                pl.BlockSpec((2 * in_dim, out_dim), lambda i, k: (0, 0)),  # W^T (resident)
                pl.BlockSpec((tile_n, out_dim), lambda i, k: (i, 0)),      # dropout bits
            ],
            out_specs=pl.BlockSpec((tile_n, out_dim), lambda i, k: (i, 0)),
            scratch_shapes=[
                pltpu.VMEM((tile_n, in_dim), jnp.float32),   # raw aggregation accumulator
                pltpu.VMEM((tile_n, 1), jnp.float32),        # neighbor-count accumulator
            ]),
        compiler_params=pltpu.CompilerParams(
            dimension_semantics=("parallel", "arbitrary"),
            vmem_limit_bytes=vmem_limit),
    )(self_feats, mask_c, embs_c, w_t, bits)

    return out[:N]


def _reference_no_dropout(nodes_idx, pre_hidden_embs, mask, weight):
    """Pure-JAX reference of SageLayer.forward with dropout disabled."""
    self_feats = pre_hidden_embs[nodes_idx]
    num_neigh = mask.sum(axis=1, keepdims=True)
    agg = jnp.dot(mask / num_neigh, pre_hidden_embs,
                  precision=jax.lax.Precision.HIGHEST)
    combined = jnp.concatenate([self_feats, agg], axis=1)
    return jnp.maximum(jnp.dot(combined, weight.T,
                               precision=jax.lax.Precision.HIGHEST), 0.0)


def _make_problem(key, N, U, K, in_dim, out_dim):
    k_emb, k_w, k_neigh = jax.random.split(key, 3)
    embs = jax.random.normal(k_emb, (U, in_dim), dtype=jnp.float32)
    bound = (6.0 / (2 * in_dim + out_dim)) ** 0.5              # xavier_uniform_
    weight = jax.random.uniform(k_w, (out_dim, 2 * in_dim),
                                minval=-bound, maxval=bound, dtype=jnp.float32)
    nodes_idx = jnp.arange(N, dtype=jnp.int32) % U
    neigh_ids = jax.random.randint(k_neigh, (N, K), 0, U)
    rows = jnp.repeat(jnp.arange(N), K)
    mask = jnp.zeros((N, U), jnp.float32).at[rows, neigh_ids.reshape(-1)].set(1.0)
    return nodes_idx, embs, mask, weight


if __name__ == "__main__":
    # --- primary small problem (matches the module's expected shapes) ----------
    N, U, K = 8, 16, 4
    in_dim, out_dim = 32, 128
    drop_rate = 0.4

    key = jax.random.PRNGKey(0)
    k_prob, k_prob2, k_drop = jax.random.split(key, 3)
    nodes_idx, embs, mask, weight = _make_problem(k_prob, N, U, K, in_dim, out_dim)

    # 1) dropout off, f32 MXU path -> must match the pure-JAX reference
    out_nodrop = sage_layer_forward(nodes_idx, embs, mask, weight,
                                    drop_rate=0.0, mxu_dtype=jnp.float32)
    ref = _reference_no_dropout(nodes_idx, embs, mask, weight)
    assert jnp.allclose(out_nodrop, ref, atol=1e-4, rtol=1e-4), "mismatch vs reference"

    # 2) multi-tile path: exercises N-tiling + U-reduction accumulator (grid > 1x1)
    N2, U2, K2 = 48, 200, 6
    in2, out2 = 16, 64
    nodes2, embs2, mask2, weight2 = _make_problem(k_prob2, N2, U2, K2, in2, out2)
    out2_nodrop = sage_layer_forward(nodes2, embs2, mask2, weight2,
                                     drop_rate=0.0, mxu_dtype=jnp.float32,
                                     tile_n=16, tile_u=128)
    ref2 = _reference_no_dropout(nodes2, embs2, mask2, weight2)
    assert jnp.allclose(out2_nodrop, ref2, atol=1e-4, rtol=1e-4), "tiled mismatch"

    # 3) full forward: bf16 MXU operands + in-kernel inverted dropout
    out = sage_layer_forward(nodes_idx, embs, mask, weight,
                             drop_rate=drop_rate, rng_key=k_drop,
                             mxu_dtype=jnp.bfloat16)
    out = jax.block_until_ready(out)
    assert out.shape == (N, out_dim)
    assert bool(jnp.all(jnp.isfinite(out)))

    print("KERNEL_OK")
</pallas_src>

<mosaic_0001>
module attributes {stable_mosaic.version = 11 : i64} {
  func.func @_sage_kernel(%arg0: i32, %arg1: i32, %arg2: memref<8x32xf32, #tpu.memory_space<vmem>>, %arg3: memref<8x16xf32, #tpu.memory_space<vmem>>, %arg4: memref<16x32xf32, #tpu.memory_space<vmem>>, %arg5: memref<64x128xf32, #tpu.memory_space<vmem>>, %arg6: memref<8x128xi32, #tpu.memory_space<vmem>>, %arg7: memref<8x128xf32, #tpu.memory_space<vmem>>, %arg8: memref<8x32xf32, #tpu.memory_space<vmem>>, %arg9: memref<8x1xf32, #tpu.memory_space<vmem>>) attributes {dimension_semantics = [#tpu.dimension_semantics<parallel>, #tpu.dimension_semantics<arbitrary>], iteration_bounds = array<i64: 1, 1>, scalar_prefetch = 0 : i64, scratch_operands = 2 : i64, tpu.core_type = #tpu.core_type<tc>, window_params = [{transform_indices = @transform_0, window_bounds = array<i64: 8, 32>}, {transform_indices = @transform_1, window_bounds = array<i64: 8, 16>}, {transform_indices = @transform_2, window_bounds = array<i64: 16, 32>}, {pipeline_mode = #tpu.pipeline_mode<synchronous>, transform_indices = @transform_3, window_bounds = array<i64: 64, 128>}, {transform_indices = @transform_4, window_bounds = array<i64: 8, 128>}, {transform_indices = @transform_5, window_bounds = array<i64: 8, 128>}]} {
    %c0_i32 = arith.constant 0 : i32
    %0 = arith.cmpi eq, %arg1, %c0_i32 : i32
    %1 = arith.extui %0 : i1 to i32
    %c0_i32_0 = arith.constant 0 : i32
    %2 = arith.cmpi ne, %1, %c0_i32_0 : i32
    scf.if %2 {
      %cst_15 = arith.constant 0.000000e+00 : f32
      %17 = vector.broadcast %cst_15 : f32 to vector<8x32xf32>
      %c0_16 = arith.constant 0 : index
      %c0_17 = arith.constant 0 : index
      %18 = vector.load %arg8[%c0_16, %c0_17] : memref<8x32xf32, #tpu.memory_space<vmem>>, vector<8x32xf32>
      tpu.vector_store %arg8[%c0_16, %c0_17], %17 {strides = array<i32>} : memref<8x32xf32, #tpu.memory_space<vmem>>, vector<8x32xf32>,
      %cst_18 = arith.constant 0.000000e+00 : f32
      %19 = vector.broadcast %cst_18 : f32 to vector<8x1xf32>
      %c0_19 = arith.constant 0 : index
      %c0_20 = arith.constant 0 : index
      %20 = vector.load %arg9[%c0_19, %c0_20] : memref<8x1xf32, #tpu.memory_space<vmem>>, vector<8x1xf32>
      tpu.vector_store %arg9[%c0_19, %c0_20], %19 {strides = array<i32>} : memref<8x1xf32, #tpu.memory_space<vmem>>, vector<8x1xf32>,
    } else {
    }
    %c0 = arith.constant 0 : index
    %c0_1 = arith.constant 0 : index
    %3 = vector.load %arg3[%c0, %c0_1] : memref<8x16xf32, #tpu.memory_space<vmem>>, vector<8x16xf32>
    %c0_2 = arith.constant 0 : index
    %c0_3 = arith.constant 0 : index
    %4 = vector.load %arg8[%c0_2, %c0_3] : memref<8x32xf32, #tpu.memory_space<vmem>>, vector<8x32xf32>
    %c0_4 = arith.constant 0 : index
    %c0_5 = arith.constant 0 : index
    %5 = vector.load %arg4[%c0_4, %c0_5] : memref<16x32xf32, #tpu.memory_space<vmem>>, vector<16x32xf32>
    %cst = arith.constant dense<0.000000e+00> : vector<8x32xf32>
    %6 = tpu.matmul %3, %5, %cst {dimension_numbers = #tpu.dot_dimension_numbers<[1], [0], [0], [1], [0, 0, 1, 1], [], []>} : vector<8x16xf32>, vector<16x32xf32>, vector<8x32xf32> -> vector<8x32xf32>
    %7 = arith.addf %4, %6 : vector<8x32xf32>
    %c0_6 = arith.constant 0 : index
    %c0_7 = arith.constant 0 : index
    %8 = vector.load %arg8[%c0_6, %c0_7] : memref<8x32xf32, #tpu.memory_space<vmem>>, vector<8x32xf32>
    tpu.vector_store %arg8[%c0_6, %c0_7], %7 {strides = array<i32>} : memref<8x32xf32, #tpu.memory_space<vmem>>, vector<8x32xf32>,
    %c0_8 = arith.constant 0 : index
    %c0_9 = arith.constant 0 : index
    %9 = vector.load %arg9[%c0_8, %c0_9] : memref<8x1xf32, #tpu.memory_space<vmem>>, vector<8x1xf32>
    %cst_10 = arith.constant dense<0.000000e+00> : vector<8xf32>
    %10 = vector.multi_reduction <add>, %3, %cst_10 [1] : vector<8x16xf32> to vector<8xf32>
    %11 = vector.shape_cast %10 : vector<8xf32> to vector<8x1xf32>
    %12 = arith.addf %9, %11 : vector<8x1xf32>
    %c0_11 = arith.constant 0 : index
    %c0_12 = arith.constant 0 : index
    %13 = vector.load %arg9[%c0_11, %c0_12] : memref<8x1xf32, #tpu.memory_space<vmem>>, vector<8x1xf32>
    tpu.vector_store %arg9[%c0_11, %c0_12], %12 {strides = array<i32>} : memref<8x1xf32, #tpu.memory_space<vmem>>, vector<8x1xf32>,
    %c0_i32_13 = arith.constant 0 : i32
    %14 = arith.cmpi eq, %arg1, %c0_i32_13 : i32
    %15 = arith.extui %14 : i1 to i32
    %c0_i32_14 = arith.constant 0 : i32
    %16 = arith.cmpi ne, %15, %c0_i32_14 : i32
    scf.if %16 {
      %c0_15 = arith.constant 0 : index
      %c0_16 = arith.constant 0 : index
      %17 = vector.load %arg9[%c0_15, %c0_16] : memref<8x1xf32, #tpu.memory_space<vmem>>, vector<8x1xf32>
      %cst_17 = arith.constant 1.000000e+00 : f32
      %18 = vector.broadcast %cst_17 : f32 to vector<8x1xf32>
      %19 = arith.maximumf %17, %18 : vector<8x1xf32>
      %cst_18 = arith.constant 1.000000e+00 : f32
      %20 = vector.broadcast %cst_18 : f32 to vector<8x1xf32>
      %21 = arith.divf %20, %19 : vector<8x1xf32>
      %c0_19 = arith.constant 0 : index
      %c0_20 = arith.constant 0 : index
      %22 = vector.load %arg8[%c0_19, %c0_20] : memref<8x32xf32, #tpu.memory_space<vmem>>, vector<8x32xf32>
      %23 = vector.broadcast %21 : vector<8x1xf32> to vector<8x32xf32>
      %24 = arith.mulf %22, %23 : vector<8x32xf32>
      %c0_21 = arith.constant 0 : index
      %c0_22 = arith.constant 0 : index
      %25 = vector.load %arg2[%c0_21, %c0_22] : memref<8x32xf32, #tpu.memory_space<vmem>>, vector<8x32xf32>
      %26 = tpu.concatenate %25, %24 in 1 : vector<8x32xf32>, vector<8x32xf32> -> vector<8x64xf32>
      %c0_23 = arith.constant 0 : index
      %c0_24 = arith.constant 0 : index
      %27 = vector.load %arg5[%c0_23, %c0_24] : memref<64x128xf32, #tpu.memory_space<vmem>>, vector<64x128xf32>
      %cst_25 = arith.constant dense<0.000000e+00> : vector<8x128xf32>
      %28 = tpu.matmul %26, %27, %cst_25 {dimension_numbers = #tpu.dot_dimension_numbers<[1], [0], [0], [1], [0, 0, 1, 1], [], []>} : vector<8x64xf32>, vector<64x128xf32>, vector<8x128xf32> -> vector<8x128xf32>
      %cst_26 = arith.constant 0.000000e+00 : f32
      %29 = vector.broadcast %cst_26 : f32 to vector<8x128xf32>
      %30 = arith.maximumf %28, %29 : vector<8x128xf32>
      %c0_27 = arith.constant 0 : index
      %c0_28 = arith.constant 0 : index
      %31 = vector.load %arg7[%c0_27, %c0_28] : memref<8x128xf32, #tpu.memory_space<vmem>>, vector<8x128xf32>
      tpu.vector_store %arg7[%c0_27, %c0_28], %30 {strides = array<i32>} : memref<8x128xf32, #tpu.memory_space<vmem>>, vector<8x128xf32>,
    } else {
    }
    return
  }
  func.func @transform_0(%arg0: i32, %arg1: i32) -> (i32, i32) {
    %c0_i32 = arith.constant 0 : i32
    %c0_i32_0 = arith.constant 0 : i32
    return %arg0, %c0_i32 : i32, i32
  }
  func.func @transform_1(%arg0: i32, %arg1: i32) -> (i32, i32) {
    %c0_i32 = arith.constant 0 : i32
    return %arg0, %arg1 : i32, i32
  }
  func.func @transform_2(%arg0: i32, %arg1: i32) -> (i32, i32) {
    %c0_i32 = arith.constant 0 : i32
    %c0_i32_0 = arith.constant 0 : i32
    return %arg1, %c0_i32 : i32, i32
  }
  func.func @transform_3(%arg0: i32, %arg1: i32) -> (i32, i32) {
    %c0_i32 = arith.constant 0 : i32
    %c0_i32_0 = arith.constant 0 : i32
    %c0_i32_1 = arith.constant 0 : i32
    return %c0_i32, %c0_i32_0 : i32, i32
  }
  func.func @transform_4(%arg0: i32, %arg1: i32) -> (i32, i32) {
    %c0_i32 = arith.constant 0 : i32
    %c0_i32_0 = arith.constant 0 : i32
    return %arg0, %c0_i32 : i32, i32
  }
  func.func @transform_5(%arg0: i32, %arg1: i32) -> (i32, i32) {
    %c0_i32 = arith.constant 0 : i32
    %c0_i32_0 = arith.constant 0 : i32
    return %arg0, %c0_i32 : i32, i32
  }
}

</mosaic_0001>

<bundles_post_ra>
// kernel: tpu_custom_call.1
= control target key start
LH: loop header
LB: loop body
LE: loop exit
PB: predicated region body
PF: predicated region fallthrough
CT: control target
= control target key end

     0   :  { %10 = vsyncpa [#allocation5], 0  ;;  %s584_s0 = inlined_call_operand.hbm [shape: f32[8,32], index: 0, kind: input, shape index: {}]   ;;  %s585_s1 = inlined_call_operand.hbm [shape: f32[8,16], index: 1, kind: input, shape index: {}]   ;;  %s586_s2 = inlined_call_operand.hbm [shape: f32[16,32], index: 2, kind: input, shape index: {}]   ;;  %s587_s3 = inlined_call_operand.hbm [shape: f32[64,128], index: 3, kind: input, shape index: {}]   ;;  %s588_s4 = inlined_call_operand.vmem [shape: u32[8,128], index: 4, kind: input, shape index: {}]   ;;  %s589_s5 = inlined_call_operand.hbm [shape: f32[8,128], index: 5, kind: output, shape index: {}]  }
   0x1   :  { %11 = vsyncpa [#allocation8], 0 }
   0x2   :  { %12 = vsyncpa [#allocation11], 0 }
   0x3   :  { %13 = vsyncpa [#allocation6], 0  ;;  %s477_s18 = smov [#allocation7]   ;;  %s478_s20 = smov [#allocation4]  }
   0x4   :  { %s30_s19 = sshll.u32 %s477_s18, 4  ;;  %s20_s21 = sshll.u32 %s478_s20, 4  ;;  %s31_s19 = int_to_ptr.vmem [resolvable:$true] %s30_s19  ;;  %s21_s21 = int_to_ptr.vmem [resolvable:$true] %s20_s21 }
   0x5   :  { %s359_s24 = scalar_lea.hbm %s585_s1, 128 }
   0x6   :  { %p360_p0 = scmp.ne.s32.totalorder %s585_s1, %s359_s24  ;;  %p363_p1 = scmp.lt.u32.totalorder %s359_s24, %s585_s1 }
   0x8   :  { %p365_p2 = pnand %p363_p1, %p360_p0 }
   0xa   :  { %368 = shalt.err (!%p365_p2)
}
   0xb   :  { %s369_s28 = scalar_lea.vmem %s31_s19, 128  ;;  %p374_p4 = scmp.lt.s32.totalorder %s31_s19, %s31_s19 }
   0xc   :  { %p370_p3 = scmp.ne.s32.totalorder %s31_s19, %s369_s28  ;;  %p375_p5 = scmp.lt.s32.totalorder %s369_s28, %s369_s28 }
   0xe   :  { %p376_p6 = por %p375_p5, %p374_p4 }
  0x10   :  { %p377_p7 = pnand %p376_p6, %p370_p3 }
  0x12   :  { %380 = shalt.err (!%p377_p7)
}
  0x13   :  { %33 = dma.hbm_to_vmem [thread:$0]  %s585_s1, 128, %s31_s19, [#allocation8]  }
  0x14   :  { %s381_s8 = scalar_lea.hbm %s584_s0, 128 }
  0x15   :  { %p382_p8 = scmp.ne.s32.totalorder %s584_s0, %s381_s8  ;;  %p385_p9 = scmp.lt.u32.totalorder %s381_s8, %s584_s0 }
  0x17   :  { %p387_p10 = pnand %p385_p9, %p382_p8 }
  0x19   :  { %390 = shalt.err (!%p387_p10)
}
  0x1a   :  { %s391_s13 = scalar_lea.vmem %s21_s21, 128  ;;  %p396_p12 = scmp.lt.s32.totalorder %s21_s21, %s21_s21 }
  0x1b   :  { %p392_p11 = scmp.ne.s32.totalorder %s21_s21, %s391_s13  ;;  %p397_p13 = scmp.lt.s32.totalorder %s391_s13, %s391_s13 }
  0x1d   :  { %p398_p0 = por %p397_p13, %p396_p12 }
  0x1f   :  { %p399_p1 = pnand %p398_p0, %p392_p11 }
  0x21   :  { %402 = shalt.err (!%p399_p1)
}
  0x22   :  { %23 = dma.hbm_to_vmem [thread:$0]  %s584_s0, 128, %s21_s21, [#allocation5]  }
  0x23   :  { %s479_s15 = smov [#allocation9]   ;;  %s403_s19 = scalar_lea.hbm %s586_s2, 256 }
  0x24   :  { %s39_s16 = sshll.u32 %s479_s15, 4  ;;  %p404_p2 = scmp.ne.s32.totalorder %s586_s2, %s403_s19  ;;  %s40_s16 = int_to_ptr.vmem [resolvable:$true] %s39_s16 }
  0x25   :  { %p407_p3 = scmp.lt.u32.totalorder %s403_s19, %s586_s2 }
  0x27   :  { %p409_p4 = pnand %p407_p3, %p404_p2 }
  0x29   :  { %412 = shalt.err (!%p409_p4)
}
  0x2a   :  { %s413_s25 = scalar_lea.vmem %s40_s16, 256  ;;  %p418_p6 = scmp.lt.s32.totalorder %s40_s16, %s40_s16 }
  0x2b   :  { %p414_p5 = scmp.ne.s32.totalorder %s40_s16, %s413_s25  ;;  %p419_p7 = scmp.lt.s32.totalorder %s413_s25, %s413_s25 }
  0x2d   :  { %p420_p8 = por %p419_p7, %p418_p6 }
  0x2f   :  { %p421_p9 = pnand %p420_p8, %p414_p5 }
  0x31   :  { %424 = shalt.err (!%p421_p9)
}
  0x32   :  { %s480_s0 = smov 128   ;;  %s481_s21 = smov 8  }
  0x33   :  { %45 = dma.hbm_to_vmem [thread:$0]  %s586_s2, 256, %s40_s16, [#allocation8], %s480_s0, %s480_s0, %s481_s21  }
  0x34   :  { %s482_s27 = smov [#allocation10]   ;;  %s425_s6 = scalar_lea.hbm %s587_s3, 1024 }
  0x35   :  { %s51_s28 = sshll.u32 %s482_s27, 4  ;;  %p426_p10 = scmp.ne.s32.totalorder %s587_s3, %s425_s6  ;;  %s52_s28 = int_to_ptr.vmem [resolvable:$true] %s51_s28 }
  0x36   :  { %p429_p11 = scmp.lt.u32.totalorder %s425_s6, %s587_s3 }
  0x38   :  { %p431_p12 = pnand %p429_p11, %p426_p10 }
  0x3a   :  { %434 = shalt.err (!%p431_p12)
}
  0x3b   :  { %s435_s11 = scalar_lea.vmem %s52_s28, 1024  ;;  %p440_p0 = scmp.lt.s32.totalorder %s52_s28, %s52_s28 }
  0x3c   :  { %p436_p13 = scmp.ne.s32.totalorder %s52_s28, %s435_s11  ;;  %p441_p1 = scmp.lt.s32.totalorder %s435_s11, %s435_s11 }
  0x3e   :  { %p442_p2 = por %p441_p1, %p440_p0 }
  0x40   :  { %p443_p3 = pnand %p442_p2, %p436_p13 }
  0x42   :  { %446 = shalt.err (!%p443_p3)
}
  0x43   :  { %57 = dma.hbm_to_vmem [thread:$0]  %s587_s3, 1024, %s52_s28, [#allocation11], %s480_s0, %s480_s0, %s481_s21  }
  0x44   :  { %469 = dma.done.wait [#allocation5], 128  }
  0x45   :  { %470 = vsyncadd [#allocation5], 4294967168 }
  0x46   :  { %471 = dma.done.wait [#allocation8], 384  }
  0x47   :  { %472 = vsyncadd [#allocation8], 4294966912 }
  0x48   :  { %473 = dma.done.wait [#allocation11], 1024  }
  0x49   :  { %474 = vsyncadd [#allocation11], 4294966272  ;;  %vm76_vm0 = vcmask 261120   ;;  %v483_v0 = vmov 0.0|0.0   ;;  %v484_v1 = vmov 0.0   ;;  %vm78_vm1 = vcmask 7168  }
  0x4a   :  { %329 = vmatprep.subr.bf16.mxu0 %v483_v0  ;;  %77 = vst.msk [vmem:[#allocation2] sm:$0xff] %vm76_vm0, %v484_v1  ;;  %332 = vmatprep.subr.bf16.mxu1 %v483_v0  ;;  %vm485_vm2 = vmmov 0   ;;  %vm84_vm3 = vcmask 130048   ;;  %v80_v2 = vld [vmem:[#allocation7] sm:$0xff]  ;;  %v82_v3 = vld [vmem:[#allocation9] sm:$0xff]  ;;  %v83_v4 = vld [vmem:[#allocation9 + $0x8] sm:$0xff] }
  0x4b   :  { %79 = vst.msk [vmem:[#allocation3] sm:$0xff] %vm78_vm1, %v484_v1  ;;  %307 = vmatprep.mubr.msk.f32.mxu0 %vm485_vm2, %v484_v1  ;;  %326 = vmatprep.mubr.msk.f32.mxu1 %vm485_vm2, %v484_v1  ;;  %v162_v5 = vsel %vm84_vm3, %v80_v2, 0.0  ;;  %v330_v6 = vpack.c.bf16 %v83_v4, %v82_v3  ;;  %v486_v7 = vmov 0   ;;  %v188_v14 = vld [vmem:[#allocation10] sm:$0xff]  ;;  %v189_v15 = vld [vmem:[#allocation10 + $0x8] sm:$0xff]  ;;  %v190_v16 = vld [vmem:[#allocation10 + $0x10] sm:$0xff] }
  0x4c   :  { %163 = vadd.xlane.f32.xlu0 %v162_v5  ;;  %v333_v17 = vpack.c.bf16 %v189_v15, %v188_v14  ;;  %v191_v18 = vld [vmem:[#allocation10 + $0x18] sm:$0xff]  ;;  %v192_v20 = vld [vmem:[#allocation10 + $0x20] sm:$0xff]  ;;  %v193_v21 = vld [vmem:[#allocation10 + $0x28] sm:$0xff]  ;;  %s487_s3 = smov 32   ;;  %vm196_vm4 = vcmask 523264   ;;  %s488_s13 = smov [#allocation12]  }
  0x4d   :  { %331 = vmatpush3.bf16.msra.mxu0 %v330_v6  ;;  %356 = vset.pattern.permute.xlu0 %v486_v7  ;;  %v336_v19 = vpack.c.bf16 %v191_v18, %v190_v16  ;;  %v339_v22 = vpack.c.bf16 %v193_v21, %v192_v20  ;;  %v194_v23 = vld [vmem:[#allocation10 + $0x30] sm:$0xff]  ;;  %v195_v24 = vld [vmem:[#allocation10 + $0x38] sm:$0xff]  ;;  %v182_v33 = vld [vmem:[#allocation4] sm:$0xff]  ;;  %s278_s1 = sshll.u32 %s488_s13, 4  ;;  %s279_s1 = int_to_ptr.vmem [resolvable:$true] %s278_s1 }
  0x4e   :  { %334 = vmatpush3.bf16.msra.mxu1 %v333_v17  ;;  %v342_v25 = vpack.c.bf16 %v195_v24, %v194_v23  ;;  %s447_s14 = scalar_lea.vmem %s279_s1, 128  ;;  %p452_p5 = scmp.lt.s32.totalorder %s279_s1, %s279_s1 }
  0x4f   :  { %335 = vmatprep.subr.bf16.mxu1 %v483_v0  ;;  %p448_p4 = scmp.ne.s32.totalorder %s279_s1, %s447_s14  ;;  %p453_p6 = scmp.lt.s32.totalorder %s447_s14, %s447_s14 }
  0x50   :  { %308 = vmatmul.mubr.msk.f32.vlgmr.msra.gmra.mrb[0].mxu0 %vm84_vm3, %v80_v2 }
  0x51   :  { %v81_v26 = vld [vmem:[#allocation2] sm:$0xff]  ;;  %p454_p7 = por %p453_p6, %p452_p5 }
  0x52   :  { %v161_v8 = vld [vmem:[#allocation3] sm:$0xff]  ;;  %337 = vmatpush3.bf16.msra.mxu1 %v336_v19 }
  0x53   :  { %338 = vmatprep.subr.bf16.mxu1 %v483_v0  ;;  %p455_p8 = pnand %p454_p7, %p448_p4 }
  0x56   :  { %340 = vmatpush3.bf16.msra.mxu1 %v339_v22 }
  0x57   :  { %341 = vmatprep.subr.bf16.mxu1 %v483_v0 }
  0x5a   :  { %343 = vmatpush3.bf16.msra.mxu1 %v342_v25 }
  0xd9   :  { %v164_v9 = vpop.xlane.xlu0 %163 }
  0xda   :  { %v165_v10 = vadd.f32 %v164_v9, %v161_v8 }
  0xdc   :  { %167 = vst.msk [vmem:[#allocation3] sm:$0xff] %vm78_vm1, %v165_v10 }
  0xe3   :  { %v171_v11 = vld [vmem:[#allocation3] sm:$0xff] }
  0xe4   :  { %v172_v12 = vmax.f32 %v171_v11, 1.0 }
  0xe6   :  { %357 = vrcp.f32 %v172_v12 }
  0xf0   :  { %v358_v13 = vpop.eup %357 }
  0xf1   :  { %178 = vperm.xlu0 %356, %v358_v13  }
 0x123   :  { %v154_v27 = vpop.f32.mrb[0].mxu0 }
 0x124   :  { %v158_v28 = vadd.f32 %v154_v27, %v81_v26  ;;  %v309_v29 = vpop.f32.mrb[1].mxu0 }
 0x126   :  { %160 = vst.msk [vmem:[#allocation2] sm:$0xff] %vm76_vm0, %v158_v28 }
 0x12d   :  { %v175_v30 = vld [vmem:[#allocation2] sm:$0xff] }
 0x170   :  { %v179_v31 = vpop.permute.xlu0 %178 }
 0x171   :  { %v181_v32 = vmul.f32 %v179_v31, %v175_v30 }
 0x173   :  { %184 = vrot.lane.b32.xlu1 %v181_v32, %s487_s3 }
 0x1e5   :  { %v185_v34 = vpop.permute.xlu1 %184 }
 0x1e6   :  { %v187_v35 = vsel %vm76_vm0, %v182_v33, %v185_v34 }
 0x1e7   :  { %327 = vmatmul.mubr.msk.f32.vlgmr.msra.gmra.mrb[0].mxu1 %vm196_vm4, %v187_v35 }
 0x2ba   :  { %v266_v36 = vpop.f32.mrb[0].mxu1 }
 0x2bb   :  { %v270_v37 = vmax.f32 %v266_v36, 0.0  ;;  %v328_v38 = vpop.f32.mrb[1].mxu1 }
 0x2bd   :  { %271 = vst [vmem:[#allocation12] sm:$0xff] %v270_v37 }
 0x2be   :  { %458 = shalt.err (!%p455_p8)
}
 0x2bf   :  { %s459_s17 = scalar_lea.hbm %s589_s5, 128 }
 0x2c0   :  { %p460_p9 = scmp.ne.s32.totalorder %s589_s5, %s459_s17  ;;  %p463_p10 = scmp.lt.u32.totalorder %s459_s17, %s589_s5 }
 0x2c2   :  { %p465_p11 = pnand %p463_p10, %p460_p9 }
 0x2c4   :  { %468 = shalt.err (!%p465_p11)
}
 0x2c5   :  { %281 = dma.vmem_to_hbm [thread:$0]  %s279_s1, 128, %s589_s5, [#allocation6]  }
 0x2c6   :  { %475 = dma.done.wait [#allocation6], 128  }
 0x2c7   :  { %476 = vsyncadd [#allocation6], 4294967168 }
 0x2c8   :  { %285 = vsyncpa [#allocation5], 1 }
 0x2c9   :  { %286 = vsyncpa [#allocation8], 1 }
 0x2ca   :  { %287 = vsyncpa [#allocation11], 1 }
 0x2cb   :  { %288 = vsyncpa [#allocation6], 1 }

</bundles_post_ra>
